<compile_context>
chip_gen: v6e
topology: v6e:2x2x1
jax: 0.10.0
libtpu: 0.0.40
codegen_flags: <defaults>
</compile_context>

<pallas_src>
import functools

import jax
import jax.numpy as jnp
from jax.experimental import pallas as pl
from jax.experimental.pallas import tpu as pltpu

NODE_TILE = 512      # scatter accumulator rows per grid step
EDGE_TILE = 2048     # edge rows per grid step (scatter + edge_we precompute)
ROW_TILE = 1024      # row tile for mem-bound projection kernels
MXU_DTYPE = jnp.bfloat16   # scatter/edge_we operand dtype (f32 accumulation); f32 => exact parity
LANE = 128
SENTINEL = 1 << 30   # padded-edge target id: never matches any node row


def _round_up(x, m):
    return ((x + m - 1) // m) * m


def _fit_tile(dim, tile):
    return min(tile, _round_up(dim, 8))


# ------------------ fused L2-normalize + projection (entity table) ------------------ #

def _norm_proj_kernel(x_ref, w_ref, p_ref, xn_ref):
    x = x_ref[...]
    nrm = jnp.sqrt(jnp.sum(x * x, axis=1, keepdims=True))
    xn = x / jnp.maximum(nrm, 1e-12)
    xn_ref[...] = xn
    p_ref[...] = jnp.dot(xn, w_ref[...], preferred_element_type=jnp.float32).astype(p_ref.dtype)


def l2norm_project(x, w, tile_rows=ROW_TILE):
    """Returns (normalize(x) @ w, normalize(x)); one HBM pass over x."""
    M, K = x.shape
    _, N = w.shape
    tm = _fit_tile(M, tile_rows)
    M_pad = _round_up(M, tm)
    if M_pad != M:
        x = jnp.pad(x, ((0, M_pad - M), (0, 0)))
    proj, xn = pl.pallas_call(
        _norm_proj_kernel,
        out_shape=(jax.ShapeDtypeStruct((M_pad, N), jnp.float32),
                   jax.ShapeDtypeStruct((M_pad, K), jnp.float32)),
        grid=(M_pad // tm,),
        in_specs=[pl.BlockSpec((tm, K), lambda i: (i, 0)),
                  pl.BlockSpec((K, N), lambda i: (0, 0))],
        out_specs=(pl.BlockSpec((tm, N), lambda i: (i, 0)),
                   pl.BlockSpec((tm, K), lambda i: (i, 0))),
        compiler_params=pltpu.CompilerParams(dimension_semantics=("parallel",)),
    )(x, w)
    return proj[:M], xn[:M]


# ------------------------------ row-tiled matmul (relations) ------------------------ #

def _rowtile_matmul_kernel(x_ref, w_ref, o_ref):
    o_ref[...] = jnp.dot(x_ref[...], w_ref[...],
                         preferred_element_type=jnp.float32).astype(o_ref.dtype)


def rowtile_matmul(x, w, tile_rows=ROW_TILE):
    M, K = x.shape
    _, N = w.shape
    tm = _fit_tile(M, tile_rows)
    M_pad = _round_up(M, tm)
    if M_pad != M:
        x = jnp.pad(x, ((0, M_pad - M), (0, 0)))
    out = pl.pallas_call(
        _rowtile_matmul_kernel,
        out_shape=jax.ShapeDtypeStruct((M_pad, N), jnp.float32),
        grid=(M_pad // tm,),
        in_specs=[pl.BlockSpec((tm, K), lambda i: (i, 0)),
                  pl.BlockSpec((K, N), lambda i: (0, 0))],
        out_specs=pl.BlockSpec((tm, N), lambda i: (i, 0)),
        compiler_params=pltpu.CompilerParams(dimension_semantics=("parallel",)),
    )(x, w)
    return out[:M]


# ----------------- one-shot per-edge attention ("edge_we") precompute --------------- #

def _edge_we_kernel(edge_m_ref, a2_ref, s_ref, st_ref, o_ref, *, alpha, pad_w):
    em = edge_m_ref[...]                                            # (TE, HF) f32
    # per-head logit: powers[e,h] = sum_f em[e, h*F+f] * a2[h,f]
    powers = jnp.dot(em * a2_ref[...], s_ref[...],
                     preferred_element_type=jnp.float32)            # (TE, H)
    lrelu = jnp.where(powers > 0, powers, alpha * powers)
    # clamp exponent so exp stays finite (the torch reference can overflow to inf here)
    edge_e = jnp.exp(jnp.minimum(-lrelu, 80.0))                     # (TE, H)
    e_b = jnp.dot(edge_e, st_ref[...],
                  preferred_element_type=jnp.float32)               # (TE, HF) per-head bcast
    edge_w = e_b * em                                               # (TE, HF)
    pieces = [edge_w, edge_e]
    if pad_w:
        pieces.append(jnp.zeros((em.shape[0], pad_w), jnp.float32))
    o_ref[...] = jnp.concatenate(pieces, axis=1).astype(o_ref.dtype)


def compute_edge_we(edge_m, a2_flat, S, S_T, *, alpha, w_pad, tile_e=EDGE_TILE):
    """(E, HF) f32 edge features -> (E_pad, Wpad) bf16 slab [edge_w | edge_e | 0]."""
    E, HF = edge_m.shape
    H = S.shape[1]
    assert w_pad >= HF + H
    te = _fit_tile(E, tile_e)
    E_pad = _round_up(E, te)
    if E_pad != E:
        edge_m = jnp.pad(edge_m, ((0, E_pad - E), (0, 0)))
    kernel = functools.partial(_edge_we_kernel, alpha=float(alpha), pad_w=w_pad - HF - H)
    out = pl.pallas_call(
        kernel,
        out_shape=jax.ShapeDtypeStruct((E_pad, w_pad), MXU_DTYPE),
        grid=(E_pad // te,),
        in_specs=[pl.BlockSpec((te, HF), lambda i: (i, 0)),
                  pl.BlockSpec((1, HF), lambda i: (0, 0)),
                  pl.BlockSpec((HF, H), lambda i: (0, 0)),
                  pl.BlockSpec((H, HF), lambda i: (0, 0))],
        out_specs=pl.BlockSpec((te, w_pad), lambda i: (i, 0)),
        compiler_params=pltpu.CompilerParams(dimension_semantics=("parallel",)),
    )(edge_m, a2_flat, S, S_T)
    return out, E_pad, te


# --------------------- fused multi-head scatter-aggregate kernel -------------------- #

def _gat_scatter_kernel(lo_ref, hi_ref, edge_we_ref, tgt_ref, stpad_ref, out_ref,
                        acc_ref, *, tile_n, hf, n_heads):
    n = pl.program_id(0)
    e = pl.program_id(1)

    @pl.when(e == 0)
    def _init():
        acc_ref[...] = jnp.zeros_like(acc_ref)

    # only edge tiles that actually contain targets for this node tile (sorted edges)
    @pl.when((e >= lo_ref[n]) & (e < hi_ref[n]))
    def _accumulate():
        te = edge_we_ref.shape[0]
        rows = jax.lax.broadcasted_iota(jnp.int32, (tile_n, te), 0)     # local 0..TN-1
        tloc = tgt_ref[...] - n * tile_n                                 # (1, TE)
        onehot = (rows == tloc).astype(MXU_DTYPE)                        # (TN, TE)
        acc_ref[...] += jnp.dot(onehot, edge_we_ref[...],
                                preferred_element_type=jnp.float32)      # (TN, Wpad) f32

    @pl.when(e == pl.num_programs(1) - 1)
    def _finalize():
        acc = acc_ref[...]
        rowsum = acc[:, hf:hf + n_heads]                                 # (TN, H)
        rowsum = jnp.where(rowsum == 0.0, 1e-12, rowsum)
        inv = pl.reciprocal(rowsum, approx=True)                         # EUP
        inv_full = jnp.dot(inv, stpad_ref[...],
                           preferred_element_type=jnp.float32)           # (TN, Wpad), 0 past HF
        out = acc * inv_full
        out = jnp.where(out > 0, out, jnp.expm1(out))                    # ELU (concat heads)
        out_ref[...] = out.astype(out_ref.dtype)


def gat_scatter_all_heads(edge_we, tgt_sorted_padded, st_pad, *, num_nodes, n_heads, hf,
                          tile_e, tile_n=NODE_TILE):
    E_pad, Wpad = edge_we.shape
    te = tile_e
    tn = _fit_tile(num_nodes, tile_n)
    N_pad = _round_up(num_nodes, tn)
    num_node_tiles = N_pad // tn
    num_edge_tiles = E_pad // te

    # Per node-tile active edge-tile range from the target-sorted edge list.
    node_starts = jnp.arange(num_node_tiles, dtype=jnp.int32) * tn
    lo_e = jnp.searchsorted(tgt_sorted_padded, node_starts, side="left").astype(jnp.int32)
    hi_e = jnp.searchsorted(tgt_sorted_padded, node_starts + tn, side="left").astype(jnp.int32)
    tile_lo = (lo_e // te).astype(jnp.int32)
    tile_hi = jnp.where(hi_e > lo_e, (hi_e + te - 1) // te, tile_lo).astype(jnp.int32)

    tgt2d = tgt_sorted_padded.reshape(1, E_pad).astype(jnp.int32)

    def edge_map(nn, ee, lo_ref, hi_ref):
        lo = lo_ref[nn]
        last = jnp.maximum(hi_ref[nn] - 1, lo)
        return (jnp.clip(ee, lo, last), 0)

    def tgt_map(nn, ee, lo_ref, hi_ref):
        lo = lo_ref[nn]
        last = jnp.maximum(hi_ref[nn] - 1, lo)
        return (0, jnp.clip(ee, lo, last))

    kernel = functools.partial(_gat_scatter_kernel, tile_n=tn, hf=hf, n_heads=n_heads)
    out = pl.pallas_call(
        kernel,
        out_shape=jax.ShapeDtypeStruct((N_pad, Wpad), jnp.float32),
        grid_spec=pltpu.PrefetchScalarGridSpec(
            num_scalar_prefetch=2,
            grid=(num_node_tiles, num_edge_tiles),
            in_specs=[
                pl.BlockSpec((te, Wpad), edge_map),                        # bf16 edge slab
                pl.BlockSpec((1, te), tgt_map),                            # target node ids
                pl.BlockSpec((n_heads, Wpad), lambda nn, ee, lo, hi: (0, 0)),  # padded S.T
            ],
            out_specs=pl.BlockSpec((tn, Wpad), lambda nn, ee, lo, hi: (nn, 0)),
            scratch_shapes=[pltpu.VMEM((tn, Wpad), jnp.float32)]),
        compiler_params=pltpu.CompilerParams(
            dimension_semantics=("parallel", "arbitrary"),
            vmem_limit_bytes=40 * 1024 * 1024),
    )(tile_lo, tile_hi, edge_we, tgt2d, st_pad)
    return out[:num_nodes, :hf]


# ------------------------------------ Module port ------------------------------------ #

class SpKBGATModifiedPallas:
    """JAX/Pallas port of SpKBGATModified (forward pass only, eval mode)."""

    def __init__(self, initial_entity_emb, initial_relation_emb, entity_out_dim,
                 relation_out_dim, drop_GAT, alpha, nheads_GAT, key):
        self.num_nodes = initial_entity_emb.shape[0]
        self.entity_in_dim = initial_entity_emb.shape[1]
        self.entity_out_dim_1 = entity_out_dim[0]
        self.nheads_GAT_1 = nheads_GAT[0]
        self.num_relation = initial_relation_emb.shape[0]
        self.relation_dim = initial_relation_emb.shape[1]
        self.drop_GAT = drop_GAT
        self.alpha = alpha

        self.entity_embeddings = jnp.array(initial_entity_emb, jnp.float32)
        self.relation_embeddings = jnp.array(initial_relation_emb, jnp.float32)

        din = self.entity_in_dim
        rel = self.relation_dim
        fin = 2 * din + rel
        fout = self.entity_out_dim_1
        H = self.nheads_GAT_1
        HF = H * fout
        self.W_PAD = _round_up(HF + H, LANE)

        # Deterministic xavier-normal-like init for each head's (a, a_2).
        self.head_params = []
        for _ in range(H):
            key, k1, k2 = jax.random.split(key, 3)
            std_a = 1.414 * (2.0 / (fout + fin)) ** 0.5
            a = std_a * jax.random.normal(k1, (fout, fin), jnp.float32)
            std_a2 = 1.414 * (2.0 / (1 + fout)) ** 0.5
            a_2 = std_a2 * jax.random.normal(k2, (1, fout), jnp.float32)
            self.head_params.append((a, a_2))

        # Project-then-gather + fused-head parameters:
        #   a = [a_src | a_dst | a_rel] along columns; stack a.T per head along outputs.
        W_src = jnp.concatenate([a[:, :din].T for (a, _) in self.head_params], axis=1)
        W_dst = jnp.concatenate([a[:, din:2 * din].T for (a, _) in self.head_params], axis=1)
        W_rel = jnp.concatenate([a[:, 2 * din:].T for (a, _) in self.head_params], axis=1)
        self.W_ent = jnp.concatenate([W_src, W_dst], axis=1)        # (din, 2*H*fout)
        self.W_rel = W_rel                                          # (rel, H*fout)
        self.a2_flat = jnp.concatenate([a2 for (_, a2) in self.head_params], axis=1)  # (1, HF)
        S = jnp.repeat(jnp.eye(H, dtype=jnp.float32), fout, axis=0)  # (HF, H) head-sum selector
        self.S = S
        self.S_T = jnp.asarray(S.T)                                  # (H, HF) per-head broadcast
        self.S_T_pad = jnp.pad(self.S_T, ((0, 0), (0, self.W_PAD - HF)))  # (H, Wpad), 0 past HF
        # TODO(synk): SpGAT.out_att parameters exist in the torch __init__ but are unused in
        # SpGAT.forward, so they are not instantiated here.

    def forward(self, Corpus_, adj, train_indices_nhop):
        del Corpus_
        edge_list, edge_type = adj[0], adj[1]

        # Constructed for parity with the torch code; not consumed by SpGAT.forward.
        edge_list_nhop = jnp.concatenate(
            [train_indices_nhop[:, 3:4], train_indices_nhop[:, 0:1]], axis=1).T
        edge_type_nhop = jnp.concatenate(
            [train_indices_nhop[:, 1:2], train_indices_nhop[:, 2:3]], axis=1)
        del edge_list_nhop, edge_type_nhop

        H, fout = self.nheads_GAT_1, self.entity_out_dim_1
        HF = H * fout

        # Fused: self.entity_embeddings = F.normalize(...); p_ent = normalize(x) @ W_ent.
        # NOTE: stateful mutation kept for parity; L2 normalization is idempotent.
        p_ent, x_norm = l2norm_project(self.entity_embeddings, self.W_ent)   # (N, 2HF), (N, din)
        self.entity_embeddings = x_norm
        p_src, p_dst = p_ent[:, :HF], p_ent[:, HF:]
        p_rel = rowtile_matmul(self.relation_embeddings, self.W_rel)         # (R, HF)

        # Sort edges by target node (enables edge-tile range skipping in the scatter).
        e0 = edge_list[0].astype(jnp.int32)
        e1 = edge_list[1].astype(jnp.int32)
        et = edge_type.astype(jnp.int32)
        order = jnp.argsort(e0)
        e0s, e1s, ets = e0[order], e1[order], et[order]

        # Per-edge gather of the projections (XLA glue).
        # TODO(synk): fuse this row gather into the edge_we kernel via DMA gather.
        edge_m = p_src[e0s] + p_dst[e1s] + p_rel[ets]                        # (E, HF) f32

        # One-shot per-edge attention math -> bf16 lane-padded edge_we slab.
        edge_we, E_pad, te = compute_edge_we(edge_m, self.a2_flat, self.S, self.S_T,
                                             alpha=self.alpha, w_pad=self.W_PAD)
        E = e0s.shape[0]
        tgt_pad = jnp.pad(e0s, (0, E_pad - E), constant_values=SENTINEL)     # sorted + sentinel

        # Fused multi-head scatter-aggregate + normalize + ELU (Pallas).
        out_entity_1 = gat_scatter_all_heads(
            edge_we, tgt_pad, self.S_T_pad,
            num_nodes=self.num_nodes, n_heads=H, hf=HF, tile_e=te)
        # SpGAT dropout_layer / in-layer dropout act as identity in eval mode.
        return out_entity_1


# ---------------------------------------- main --------------------------------------- #

if __name__ == "__main__":
    key = jax.random.PRNGKey(0)
    k_ent, k_rel, k_edge, k_type, k_nhop, k_params = jax.random.split(key, 6)

    num_nodes = 32
    entity_in_dim = 16
    relation_dim = 16
    num_relation = 8
    E = 64
    n_nhop = 10

    entity_out_dim = [32, 32]
    relation_out_dim = [32]
    nheads_GAT = [2, 2]
    drop_GAT = 0.3
    alpha = 0.2

    initial_entity_emb = jax.random.normal(k_ent, (num_nodes, entity_in_dim), jnp.float32)
    initial_relation_emb = jax.random.normal(k_rel, (num_relation, relation_dim), jnp.float32)

    edge_list = jax.random.randint(k_edge, (2, E), 0, num_nodes, jnp.int32)
    edge_type = jax.random.randint(k_type, (E,), 0, num_relation, jnp.int32)
    train_indices_nhop = jax.random.randint(k_nhop, (n_nhop, 4), 0, num_nodes, jnp.int32)

    model = SpKBGATModifiedPallas(initial_entity_emb, initial_relation_emb,
                                  entity_out_dim, relation_out_dim,
                                  drop_GAT, alpha, nheads_GAT, k_params)

    out = model.forward(None, (edge_list, edge_type), train_indices_nhop)
    out = jax.block_until_ready(out)

    expected_shape = (num_nodes, entity_out_dim[0] * nheads_GAT[0])
    assert out.shape == expected_shape, (out.shape, expected_shape)
    assert bool(jnp.all(jnp.isfinite(out)))
    print("KERNEL_OK")
</pallas_src>

<mosaic_0001>
module attributes {stable_mosaic.version = 11 : i64} {
  func.func @_norm_proj_kernel(%arg0: i32, %arg1: memref<32x16xf32, #tpu.memory_space<vmem>>, %arg2: memref<16x128xf32, #tpu.memory_space<vmem>>, %arg3: memref<32x128xf32, #tpu.memory_space<vmem>>, %arg4: memref<32x16xf32, #tpu.memory_space<vmem>>) attributes {dimension_semantics = [#tpu.dimension_semantics<parallel>], iteration_bounds = array<i64: 1>, scalar_prefetch = 0 : i64, scratch_operands = 0 : i64, tpu.core_type = #tpu.core_type<tc>, window_params = [{transform_indices = @transform_0, window_bounds = array<i64: 32, 16>}, {pipeline_mode = #tpu.pipeline_mode<synchronous>, transform_indices = @transform_1, window_bounds = array<i64: 16, 128>}, {transform_indices = @transform_2, window_bounds = array<i64: 32, 128>}, {transform_indices = @transform_3, window_bounds = array<i64: 32, 16>}]} {
    %c0 = arith.constant 0 : index
    %c0_0 = arith.constant 0 : index
    %0 = vector.load %arg1[%c0, %c0_0] : memref<32x16xf32, #tpu.memory_space<vmem>>, vector<32x16xf32>
    %1 = arith.mulf %0, %0 : vector<32x16xf32>
    %cst = arith.constant dense<0.000000e+00> : vector<32xf32>
    %2 = vector.multi_reduction <add>, %1, %cst [1] : vector<32x16xf32> to vector<32xf32>
    %3 = vector.shape_cast %2 : vector<32xf32> to vector<32x1xf32>
    %4 = math.sqrt %3 : vector<32x1xf32>
    %cst_1 = arith.constant 9.99999996E-13 : f32
    %5 = vector.broadcast %cst_1 : f32 to vector<32x1xf32>
    %6 = arith.maximumf %4, %5 : vector<32x1xf32>
    %7 = vector.broadcast %6 : vector<32x1xf32> to vector<32x16xf32>
    %8 = arith.divf %0, %7 : vector<32x16xf32>
    %c0_2 = arith.constant 0 : index
    %c0_3 = arith.constant 0 : index
    %9 = vector.load %arg4[%c0_2, %c0_3] : memref<32x16xf32, #tpu.memory_space<vmem>>, vector<32x16xf32>
    tpu.vector_store %arg4[%c0_2, %c0_3], %8 {strides = array<i32>} : memref<32x16xf32, #tpu.memory_space<vmem>>, vector<32x16xf32>,
    %c0_4 = arith.constant 0 : index
    %c0_5 = arith.constant 0 : index
    %10 = vector.load %arg2[%c0_4, %c0_5] : memref<16x128xf32, #tpu.memory_space<vmem>>, vector<16x128xf32>
    %cst_6 = arith.constant dense<0.000000e+00> : vector<32x128xf32>
    %11 = tpu.matmul %8, %10, %cst_6 {dimension_numbers = #tpu.dot_dimension_numbers<[1], [0], [0], [1], [0, 0, 1, 1], [], []>} : vector<32x16xf32>, vector<16x128xf32>, vector<32x128xf32> -> vector<32x128xf32>
    %c0_7 = arith.constant 0 : index
    %c0_8 = arith.constant 0 : index
    %12 = vector.load %arg3[%c0_7, %c0_8] : memref<32x128xf32, #tpu.memory_space<vmem>>, vector<32x128xf32>
    tpu.vector_store %arg3[%c0_7, %c0_8], %11 {strides = array<i32>} : memref<32x128xf32, #tpu.memory_space<vmem>>, vector<32x128xf32>,
    return
  }
  func.func @transform_0(%arg0: i32) -> (i32, i32) {
    %c0_i32 = arith.constant 0 : i32
    %c0_i32_0 = arith.constant 0 : i32
    return %arg0, %c0_i32 : i32, i32
  }
  func.func @transform_1(%arg0: i32) -> (i32, i32) {
    %c0_i32 = arith.constant 0 : i32
    %c0_i32_0 = arith.constant 0 : i32
    %c0_i32_1 = arith.constant 0 : i32
    return %c0_i32, %c0_i32_0 : i32, i32
  }
  func.func @transform_2(%arg0: i32) -> (i32, i32) {
    %c0_i32 = arith.constant 0 : i32
    %c0_i32_0 = arith.constant 0 : i32
    return %arg0, %c0_i32 : i32, i32
  }
  func.func @transform_3(%arg0: i32) -> (i32, i32) {
    %c0_i32 = arith.constant 0 : i32
    %c0_i32_0 = arith.constant 0 : i32
    return %arg0, %c0_i32 : i32, i32
  }
}

</mosaic_0001>

<bundles_post_ra>
// kernel: tpu_custom_call.1
= control target key start
LH: loop header
LB: loop body
LE: loop exit
PB: predicated region body
PF: predicated region fallthrough
CT: control target
= control target key end

     0   :  { %vm22_vm0 = vcmask 130048   ;;  %s355_s0 = inlined_call_operand.vmem [shape: f32[32,16], index: 0, kind: input, shape index: {}]   ;;  %s356_s1 = inlined_call_operand.vmem [shape: f32[16,128], index: 1, kind: input, shape index: {}]   ;;  %s357_s2 = inlined_call_operand.hbm [shape: f32[32,128], index: 2, kind: output, shape index: {0}]   ;;  %s358_s3 = inlined_call_operand.vmem [shape: f32[32,16], index: 3, kind: output, shape index: {1}]  }
   0x1   :  { %v293_v0 = vld [vmem:[%s355_s0 + $0x8] sm:$0xff]  ;;  %v298_v1 = vld [vmem:[%s355_s0] sm:$0xff]  ;;  %v303_v2 = vld [vmem:[%s355_s0 + $0x18] sm:$0xff] }
   0x2   :  { %v19_v3 = vmul.f32 %v293_v0, %v293_v0  ;;  %v18_v4 = vmul.f32 %v298_v1, %v298_v1  ;;  %v21_v5 = vmul.f32 %v303_v2, %v303_v2  ;;  %v314_v6 = vld [vmem:[%s355_s0 + $0x10] sm:$0xff] }
   0x3   :  { %9 = vsyncpa [#allocation3], 0  ;;  %v20_v7 = vmul.f32 %v314_v6, %v314_v6  ;;  %v80_v12 = vld [vmem:[%s356_s1 + $0x8] sm:$0xff]  ;;  %v79_v13 = vld [vmem:[%s356_s1] sm:$0xff]  ;;  %s267_s30 = smov [#allocation2]  }
   0x4   :  { %v26_v8 = vsel %vm22_vm0, %v19_v3, 0.0  ;;  %v23_v9 = vsel %vm22_vm0, %v18_v4, 0.0  ;;  %v32_v10 = vsel %vm22_vm0, %v21_v5, 0.0  ;;  %212 = vmatprep.subr.mxu0 %v80_v12  ;;  %222 = vmatprep.subr.mxu1 %v80_v12  ;;  %s187_s4 = sshll.u32 %s267_s30, 4  ;;  %s188_s4 = int_to_ptr.vmem [resolvable:$true] %s187_s4 }
   0x5   :  { %27 = vadd.xlane.f32.xlu1 %v26_v8  ;;  %24 = vadd.xlane.f32.xlu0 %v23_v9  ;;  %v29_v11 = vsel %vm22_vm0, %v20_v7, 0.0  ;;  %s245_s5 = scalar_lea.vmem %s188_s4, 512  ;;  %p250_p1 = scmp.lt.s32.totalorder %s188_s4, %s188_s4 }
   0x6   :  { %213 = vmatpush3.msra.mxu0 %v80_v12  ;;  %224 = vmatpush3.msra.mxu1 %v80_v12  ;;  %p246_p0 = scmp.ne.s32.totalorder %s188_s4, %s245_s5  ;;  %p251_p2 = scmp.lt.s32.totalorder %s245_s5, %s245_s5 }
   0x7   :  { %214 = vmatprep.subr.mxu0 %v79_v13  ;;  %223 = vmatprep.subr.mxu1 %v79_v13 }
   0x8   :  { %215 = vmatpush3.msra.mxu0 %v79_v13  ;;  %225 = vmatpush3.msra.mxu1 %v79_v13  ;;  %p252_p3 = por %p251_p2, %p250_p1 }
   0x9   :  { %33 = vadd.xlane.f32.xlu1 %v32_v10  ;;  %30 = vadd.xlane.f32.xlu0 %v29_v11 }
   0xa   :  { %p253_p4 = pnand %p252_p3, %p246_p0 }
  0x8e   :  { %v28_v14 = vpop.xlane.xlu1 %27  ;;  %v25_v15 = vpop.xlane.xlu0 %24 }
  0x8f   :  { %229 = vrsqrt.f32 %v28_v14  ;;  %vm44_vm1 = vcmp.eq.f32.partialorder %v28_v14, inf  ;;  %v47_v21 = vand.u32 2147483648, %v28_v14  ;;  %vm46_vm2 = vcmp.eq.f32.partialorder %v28_v14, 0.0 }
  0x90   :  { %231 = vrsqrt.f32 %v25_v15  ;;  %vm37_vm3 = vcmp.eq.f32.partialorder %v25_v15, inf  ;;  %v40_v24 = vand.u32 2147483648, %v25_v15  ;;  %vm39_vm4 = vcmp.eq.f32.partialorder %v25_v15, 0.0 }
  0x92   :  { %v34_v16 = vpop.xlane.xlu1 %33  ;;  %v31_v17 = vpop.xlane.xlu0 %30 }
  0x93   :  { %233 = vrsqrt.f32 %v34_v16  ;;  %vm58_vm5 = vcmp.eq.f32.partialorder %v34_v16, inf  ;;  %vm60_vm6 = vcmp.eq.f32.partialorder %v34_v16, 0.0  ;;  %v61_v33 = vand.u32 2147483648, %v34_v16 }
  0x94   :  { %235 = vrsqrt.f32 %v31_v17  ;;  %vm51_vm7 = vcmp.eq.f32.partialorder %v31_v17, inf  ;;  %v54_v36 = vand.u32 2147483648, %v31_v17  ;;  %vm53_vm8 = vcmp.eq.f32.partialorder %v31_v17, 0.0 }
  0x9c   :  { %v230_v18 = vpop.eup %229 }
  0x9d   :  { %v232_v19 = vpop.eup %231  ;;  %v43_v20 = vmul.f32 %v230_v18, %v28_v14 }
  0x9e   :  { %v36_v22 = vmul.f32 %v232_v19, %v25_v15 }
  0x9f   :  { %v45_v23 = vsel %vm44_vm1, %v28_v14, %v43_v20 }
  0xa0   :  { %v234_v25 = vpop.eup %233  ;;  %v48_v26 = vsel %vm46_vm2, %v47_v21, %v45_v23  ;;  %v38_v27 = vsel %vm37_vm3, %v25_v15, %v36_v22 }
  0xa1   :  { %v236_v28 = vpop.eup %235  ;;  %v64_v29 = vmax.f32 %v48_v26, 1e-12  ;;  %v41_v30 = vsel %vm39_vm4, %v40_v24, %v38_v27  ;;  %v57_v31 = vmul.f32 %v234_v25, %v34_v16 }
  0xa2   :  { %v63_v32 = vmax.f32 %v41_v30, 1e-12  ;;  %v50_v34 = vmul.f32 %v236_v28, %v31_v17 }
  0xa3   :  { %237 = vrcp.f32 %v64_v29  ;;  %v59_v35 = vsel %vm58_vm5, %v34_v16, %v57_v31 }
  0xa4   :  { %239 = vrcp.f32 %v63_v32  ;;  %v62_v37 = vsel %vm60_vm6, %v61_v33, %v59_v35  ;;  %v52_v38 = vsel %vm51_vm7, %v31_v17, %v50_v34 }
  0xa5   :  { %v66_v39 = vmax.f32 %v62_v37, 1e-12  ;;  %v55_v40 = vsel %vm53_vm8, %v54_v36, %v52_v38 }
  0xa6   :  { %v65_v41 = vmax.f32 %v55_v40, 1e-12 }
  0xa7   :  { %241 = vrcp.f32 %v66_v39 }
  0xa8   :  { %243 = vrcp.f32 %v65_v41 }
  0xb0   :  { %v238_v42 = vpop.eup %237 }
  0xb1   :  { %v240_v43 = vpop.eup %239  ;;  %v70_v44 = vmul.f32 %v238_v42, %v293_v0 }
  0xb2   :  { %v68_v45 = vmul.f32 %v240_v43, %v298_v1 }
  0xb3   :  { %76 = vst.msk [vmem:[%s358_s3 + $0x8] sm:$0xff] %vm22_vm0, %v70_v44 }
  0xb4   :  { %v242_v46 = vpop.eup %241  ;;  %75 = vst.msk [vmem:[%s358_s3] sm:$0xff] %vm22_vm0, %v68_v45  ;;  %216 = vmatprep.mubr.msk.f32.mxu0 %vm22_vm0, %v68_v45 }
  0xb5   :  { %v244_v47 = vpop.eup %243  ;;  %217 = vmatmul.mubr.msk.f32.vlgmr.msra.gmra.mxu0 %vm22_vm0, %v70_v44  ;;  %v74_v48 = vmul.f32 %v242_v46, %v303_v2 }
  0xb6   :  { %v72_v49 = vmul.f32 %v244_v47, %v314_v6 }
  0xb7   :  { %78 = vst.msk [vmem:[%s358_s3 + $0x18] sm:$0xff] %vm22_vm0, %v74_v48 }
  0xb8   :  { %77 = vst.msk [vmem:[%s358_s3 + $0x10] sm:$0xff] %vm22_vm0, %v72_v49  ;;  %219 = vmatprep.mubr.msk.f32.mxu1 %vm22_vm0, %v72_v49 }
  0xb9   :  { %220 = vmatmul.mubr.msk.f32.vlgmr.msra.gmra.mxu1 %vm22_vm0, %v74_v48 }
 0x175   :  { %v218_v50 = vpop.f32.mrf.mxu0 }
 0x176   :  { %179 = vst [vmem:[#allocation2 + $0x8] sm:$0xff] %v218_v50 }
 0x177   :  { %v159_v51 = vpop.f32.mrf.mxu0 }
 0x178   :  { %178 = vst [vmem:[#allocation2] sm:$0xff] %v159_v51 }
 0x179   :  { %v221_v52 = vpop.f32.mrf.mxu1 }
 0x17a   :  { %181 = vst [vmem:[#allocation2 + $0x18] sm:$0xff] %v221_v52 }
 0x17b   :  { %v169_v53 = vpop.f32.mrf.mxu1 }
 0x17c   :  { %180 = vst [vmem:[#allocation2 + $0x10] sm:$0xff] %v169_v53 }
 0x17d   :  { %256 = shalt.err (!%p253_p4)
}
 0x17e   :  { %s268_s3 = smov 128   ;;  %s269_s6 = smov 8  }
 0x17f   :  { %193 = dma.vmem_to_hbm [thread:$0]  %s188_s4, 512, %s357_s2, [#allocation3], %s268_s3, %s268_s3, %s269_s6  }
 0x180   :  { %265 = dma.done.wait [#allocation3], 512  }
 0x181   :  { %266 = vsyncadd [#allocation3], 4294966784 }
 0x182   :  { %201 = vsyncpa [#allocation3], 1 }

</bundles_post_ra>
